<compile_context>
chip_gen: v7x
topology: tpu7x:2x2x1
jax: 0.10.0
libtpu: 0.0.40
codegen_flags: <defaults>
</compile_context>

<pallas_src>
import jax
import jax.numpy as jnp
import numpy as np
from jax.experimental import pallas as pl
from jax.experimental.pallas import tpu as pltpu

LN_EPS = 1e-5  # torch.nn.LayerNorm default


# ---------------------------------------------------------------------------
# Fused kernel: state encoder + concat-free layer 1 + block-diag layer 2 +
# block output heads.  Single invocation (no grid); everything VMEM-resident.
# ---------------------------------------------------------------------------
def fused_critic_ensemble_kernel(state_ref, act_ref,
                                 enc_w_ref, enc_vecs_ref,
                                 w1e_ref, w1a_ref, crit_vecs_ref,
                                 w2_ref, seg_ref, wo_t_ref, bo_ref,
                                 out_ref):
    f32 = jnp.float32

    # --- SACObservationEncoder.state_encoder: tanh(LN(state @ W + b)) ---
    he = jnp.dot(state_ref[...], enc_w_ref[...], preferred_element_type=f32)
    he = he + enc_vecs_ref[0:1, :]                                   # + enc_b
    m = jnp.mean(he, axis=-1, keepdims=True)
    msq = jnp.mean(he * he, axis=-1, keepdims=True)
    inv = jax.lax.rsqrt(msq - m * m + LN_EPS)                        # one-pass var
    obs = jnp.tanh((he - m) * inv * enc_vecs_ref[1:2, :] + enc_vecs_ref[2:3, :])  # (B, L)

    seg = seg_ref[...]                                               # (EH, EH) block 1/H

    def seg_layernorm_silu(h, gamma, beta):
        # Per-critic (H-wide segment) LayerNorm done lane-dense on the MXU:
        # mean / E[x^2] broadcast within each segment via block-diag 1/H matrix.
        sm = jnp.dot(h, seg, preferred_element_type=f32)             # segment mean
        ssq = jnp.dot(h * h, seg, preferred_element_type=f32)        # segment E[x^2]
        sinv = jax.lax.rsqrt(ssq - sm * sm + LN_EPS)
        y = (h - sm) * sinv * gamma + beta
        return y * jax.nn.sigmoid(y)                                 # SiLU

    # --- critic layer 1: concat-free, ensemble folded into N = E*H ---
    h1 = (jnp.dot(obs, w1e_ref[...], preferred_element_type=f32)
          + jnp.dot(act_ref[...], w1a_ref[...], preferred_element_type=f32)
          + crit_vecs_ref[0:1, :])                                   # (B, E*H)
    h1 = seg_layernorm_silu(h1, crit_vecs_ref[1:2, :], crit_vecs_ref[2:3, :])

    # --- critic layer 2: block-diagonal weight -> single matmul ---
    h2 = jnp.dot(h1, w2_ref[...], preferred_element_type=f32) + crit_vecs_ref[3:4, :]
    h2 = seg_layernorm_silu(h2, crit_vecs_ref[4:5, :], crit_vecs_ref[5:6, :])

    # --- output heads: q[e,b] = <h2[b, seg_e], wo[e]> + bo[e]  (one MXU op) ---
    q_eb = jax.lax.dot_general(wo_t_ref[...], h2,
                               (((1,), (1,)), ((), ())),
                               preferred_element_type=f32)           # (E, B)
    out_ref[...] = q_eb + bo_ref[...]                                # + bo, lane-dense (B on lanes)


# ---------------------------------------------------------------------------
# Wrapper
# ---------------------------------------------------------------------------
def critic_ensemble_forward(packed, observations, actions):
    state = observations["observation.state"].astype(jnp.float32)
    actions = actions.astype(jnp.float32)       # output_normalization == identity
    B, S = state.shape
    A = actions.shape[-1]
    E, EH = packed["wo_t"].shape
    L = packed["enc_w"].shape[1]

    args = (state, actions,
            packed["enc_w"], packed["enc_vecs"],
            packed["w1e_flat"], packed["w1a_flat"], packed["crit_vecs"],
            packed["w2_blk"], packed["seg_mean"], packed["wo_t"], packed["bo_col"])

    flops = (2 * B * S * L                     # encoder Linear
             + 2 * B * (L + A) * EH            # critic layer 1
             + 2 * B * EH * EH                 # critic layer 2 (block-diag)
             + 8 * B * EH * EH                 # 4 segment-mean matmuls (2 LNs)
             + 2 * B * EH * E)                 # output heads
    transcendentals = B * L + 4 * B * EH + B   # tanh + SiLU sigmoids + LN rsqrts
    bytes_accessed = sum(int(np.prod(a.shape)) * 4 for a in args) + E * B * 4

    vmem_spec = pl.BlockSpec(memory_space=pltpu.MemorySpace.VMEM)
    return pl.pallas_call(
        fused_critic_ensemble_kernel,
        out_shape=jax.ShapeDtypeStruct((E, B), jnp.float32),
        in_specs=[vmem_spec] * len(args),
        out_specs=vmem_spec,
        cost_estimate=pl.CostEstimate(flops=flops,
                                      transcendentals=transcendentals,
                                      bytes_accessed=bytes_accessed),
    )(*args)


# ---------------------------------------------------------------------------
# Host-side one-time weight packing (ensemble folded into lanes / block-diag).
# ---------------------------------------------------------------------------
def pack_params(params):
    enc_w = np.asarray(params["enc_w"], np.float32)                  # (S, L)
    L = enc_w.shape[1]
    w1_enc = np.asarray(params["w1_enc"], np.float32)                # (E, L, H)
    w1_act = np.asarray(params["w1_act"], np.float32)                # (E, A, H)
    E, _, H = w1_enc.shape
    A = w1_act.shape[1]
    EH = E * H

    enc_vecs = np.stack([np.asarray(params["enc_b"], np.float32),
                         np.asarray(params["enc_g"], np.float32),
                         np.asarray(params["enc_bt"], np.float32)])  # (3, L)

    w1e_flat = np.transpose(w1_enc, (1, 0, 2)).reshape(L, EH)        # (L, E*H)
    w1a_flat = np.transpose(w1_act, (1, 0, 2)).reshape(A, EH)        # (A, E*H)

    crit_vecs = np.stack([np.asarray(params[k], np.float32).reshape(EH)
                          for k in ("b1", "g1", "bt1", "b2", "g2", "bt2")])  # (6, E*H)

    w2 = np.asarray(params["w2"], np.float32)                        # (E, H, H)
    wo = np.asarray(params["wo"], np.float32)                        # (E, H)
    w2_blk = np.zeros((EH, EH), np.float32)
    seg_mean = np.zeros((EH, EH), np.float32)
    wo_t = np.zeros((E, EH), np.float32)
    for e in range(E):
        sl = slice(e * H, (e + 1) * H)
        w2_blk[sl, sl] = w2[e]
        seg_mean[sl, sl] = 1.0 / H
        wo_t[e, sl] = wo[e]
    bo_col = np.asarray(params["bo"], np.float32).reshape(E, 1)

    return {
        "enc_w": jnp.asarray(enc_w), "enc_vecs": jnp.asarray(enc_vecs),
        "w1e_flat": jnp.asarray(w1e_flat), "w1a_flat": jnp.asarray(w1a_flat),
        "crit_vecs": jnp.asarray(crit_vecs), "w2_blk": jnp.asarray(w2_blk),
        "seg_mean": jnp.asarray(seg_mean), "wo_t": jnp.asarray(wo_t),
        "bo_col": jnp.asarray(bo_col),
    }


# ---------------------------------------------------------------------------
# Pure-JAX reference (mirrors the PyTorch forward: two-pass LN, explicit
# concat, per-critic loop) for the correctness check.
# ---------------------------------------------------------------------------
def _ln_ref(h, gamma, beta):
    mean = jnp.mean(h, axis=-1, keepdims=True)
    var = jnp.mean(jnp.square(h - mean), axis=-1, keepdims=True)
    return (h - mean) * jax.lax.rsqrt(var + LN_EPS) * gamma + beta


def _silu(h):
    return h * jax.nn.sigmoid(h)


def reference_forward(params, observations, actions):
    state = observations["observation.state"].astype(jnp.float32)
    actions = actions.astype(jnp.float32)
    h = state @ params["enc_w"] + params["enc_b"]
    obs_enc = jnp.tanh(_ln_ref(h, params["enc_g"], params["enc_bt"]))
    x = jnp.concatenate([obs_enc, actions], axis=-1)
    E = params["w1_enc"].shape[0]
    qs = []
    for e in range(E):
        w1_full = jnp.concatenate([params["w1_enc"][e], params["w1_act"][e]], axis=0)
        h1 = _silu(_ln_ref(x @ w1_full + params["b1"][e], params["g1"][e], params["bt1"][e]))
        h2 = _silu(_ln_ref(h1 @ params["w2"][e] + params["b2"][e], params["g2"][e], params["bt2"][e]))
        qs.append(h2 @ params["wo"][e] + params["bo"][e])
    return jnp.stack(qs, axis=0)


def make_params(key, state_dim, action_dim, latent, hidden, num_critics):
    ks = jax.random.split(key, 9)
    f32 = jnp.float32
    E, H, L = num_critics, hidden, latent
    return {
        # state encoder: Linear(state_dim, latent) -> LayerNorm -> Tanh
        "enc_w": 0.1 * jax.random.normal(ks[0], (state_dim, L), f32),
        "enc_b": 0.01 * jax.random.normal(ks[1], (L,), f32),
        "enc_g": jnp.ones((L,), f32),
        "enc_bt": jnp.zeros((L,), f32),
        # critic heads; first Linear split into encoder / action halves
        "w1_enc": 0.1 * jax.random.normal(ks[2], (E, L, H), f32),
        "w1_act": 0.1 * jax.random.normal(ks[3], (E, action_dim, H), f32),
        "b1": 0.01 * jax.random.normal(ks[4], (E, H), f32),
        "g1": jnp.ones((E, H), f32),
        "bt1": jnp.zeros((E, H), f32),
        "w2": 0.1 * jax.random.normal(ks[5], (E, H, H), f32),
        "b2": 0.01 * jax.random.normal(ks[6], (E, H), f32),
        "g2": jnp.ones((E, H), f32),
        "bt2": jnp.zeros((E, H), f32),
        # output Linear(H, 1)
        "wo": 0.1 * jax.random.normal(ks[7], (E, H), f32),
        "bo": 0.01 * jax.random.normal(ks[8], (E,), f32),
    }


if __name__ == "__main__":
    B, state_dim, action_dim = 8, 12, 6
    latent, hidden, num_critics = 32, 32, 3

    key = jax.random.PRNGKey(0)
    k_p, k_s, k_a = jax.random.split(key, 3)
    params = make_params(k_p, state_dim, action_dim, latent, hidden, num_critics)
    packed = pack_params(params)

    observations = {"observation.state": jax.random.normal(k_s, (B, state_dim), jnp.float32)}
    actions = jax.random.normal(k_a, (B, action_dim), jnp.float32)

    q = jax.block_until_ready(critic_ensemble_forward(packed, observations, actions))
    q_ref = jax.block_until_ready(reference_forward(params, observations, actions))

    assert q.shape == (num_critics, B), q.shape
    np.testing.assert_allclose(np.asarray(q), np.asarray(q_ref), rtol=1e-4, atol=1e-4)

    # TODO(synk): image branch (DefaultImageEncoder conv stack + SpatialLearnedEmbeddings +
    # PretrainedImageEncoder) is not instantiated in this state-only config and is not kernelized.
    print("KERNEL_OK")
</pallas_src>

<mosaic_0001>
module attributes {stable_mosaic.version = 11 : i64} {
  func.func @fused_critic_ensemble_kernel(%arg0: memref<8x12xf32, #tpu.memory_space<vmem>>, %arg1: memref<8x6xf32, #tpu.memory_space<vmem>>, %arg2: memref<12x32xf32, #tpu.memory_space<vmem>>, %arg3: memref<3x32xf32, #tpu.memory_space<vmem>>, %arg4: memref<32x96xf32, #tpu.memory_space<vmem>>, %arg5: memref<6x96xf32, #tpu.memory_space<vmem>>, %arg6: memref<6x96xf32, #tpu.memory_space<vmem>>, %arg7: memref<96x96xf32, #tpu.memory_space<vmem>>, %arg8: memref<96x96xf32, #tpu.memory_space<vmem>>, %arg9: memref<3x96xf32, #tpu.memory_space<vmem>>, %arg10: memref<3x1xf32, #tpu.memory_space<vmem>>, %arg11: memref<3x8xf32, #tpu.memory_space<vmem>>) attributes {dimension_semantics = [], scalar_prefetch = 0 : i64, scratch_operands = 0 : i64, tpu.core_type = #tpu.core_type<tc>} {
    %c0 = arith.constant 0 : index
    %c0_0 = arith.constant 0 : index
    %0 = vector.load %arg0[%c0, %c0_0] : memref<8x12xf32, #tpu.memory_space<vmem>>, vector<8x12xf32>
    %c0_1 = arith.constant 0 : index
    %c0_2 = arith.constant 0 : index
    %1 = vector.load %arg2[%c0_1, %c0_2] : memref<12x32xf32, #tpu.memory_space<vmem>>, vector<12x32xf32>
    %cst = arith.constant dense<0.000000e+00> : vector<8x32xf32>
    %2 = tpu.matmul %0, %1, %cst {dimension_numbers = #tpu.dot_dimension_numbers<[1], [0], [0], [1], [0, 0, 1, 1], [], []>} : vector<8x12xf32>, vector<12x32xf32>, vector<8x32xf32> -> vector<8x32xf32>
    %c0_3 = arith.constant 0 : index
    %c0_4 = arith.constant 0 : index
    %3 = vector.load %arg3[%c0_3, %c0_4] : memref<3x32xf32, #tpu.memory_space<vmem>>, vector<1x32xf32>
    %4 = vector.broadcast %3 : vector<1x32xf32> to vector<8x32xf32>
    %5 = arith.addf %2, %4 : vector<8x32xf32>
    %cst_5 = arith.constant dense<0.000000e+00> : vector<8xf32>
    %6 = vector.multi_reduction <add>, %5, %cst_5 [1] : vector<8x32xf32> to vector<8xf32>
    %7 = vector.shape_cast %6 : vector<8xf32> to vector<8x1xf32>
    %cst_6 = arith.constant 3.200000e+01 : f32
    %8 = vector.broadcast %cst_6 : f32 to vector<8x1xf32>
    %9 = arith.divf %7, %8 : vector<8x1xf32>
    %10 = arith.mulf %5, %5 : vector<8x32xf32>
    %cst_7 = arith.constant dense<0.000000e+00> : vector<8xf32>
    %11 = vector.multi_reduction <add>, %10, %cst_7 [1] : vector<8x32xf32> to vector<8xf32>
    %12 = vector.shape_cast %11 : vector<8xf32> to vector<8x1xf32>
    %cst_8 = arith.constant 3.200000e+01 : f32
    %13 = vector.broadcast %cst_8 : f32 to vector<8x1xf32>
    %14 = arith.divf %12, %13 : vector<8x1xf32>
    %15 = arith.mulf %9, %9 : vector<8x1xf32>
    %16 = arith.subf %14, %15 : vector<8x1xf32>
    %cst_9 = arith.constant 9.99999974E-6 : f32
    %17 = vector.broadcast %cst_9 : f32 to vector<8x1xf32>
    %18 = arith.addf %16, %17 : vector<8x1xf32>
    %19 = math.rsqrt %18 : vector<8x1xf32>
    %20 = vector.broadcast %9 : vector<8x1xf32> to vector<8x32xf32>
    %21 = arith.subf %5, %20 : vector<8x32xf32>
    %22 = vector.broadcast %19 : vector<8x1xf32> to vector<8x32xf32>
    %23 = arith.mulf %21, %22 : vector<8x32xf32>
    %c1 = arith.constant 1 : index
    %c0_10 = arith.constant 0 : index
    %24 = vector.load %arg3[%c1, %c0_10] : memref<3x32xf32, #tpu.memory_space<vmem>>, vector<1x32xf32>
    %25 = vector.broadcast %24 : vector<1x32xf32> to vector<8x32xf32>
    %26 = arith.mulf %23, %25 : vector<8x32xf32>
    %c2 = arith.constant 2 : index
    %c0_11 = arith.constant 0 : index
    %27 = vector.load %arg3[%c2, %c0_11] : memref<3x32xf32, #tpu.memory_space<vmem>>, vector<1x32xf32>
    %28 = vector.broadcast %27 : vector<1x32xf32> to vector<8x32xf32>
    %29 = arith.addf %26, %28 : vector<8x32xf32>
    %30 = math.tanh %29 : vector<8x32xf32>
    %c0_12 = arith.constant 0 : index
    %c0_13 = arith.constant 0 : index
    %31 = vector.load %arg8[%c0_12, %c0_13] : memref<96x96xf32, #tpu.memory_space<vmem>>, vector<96x96xf32>
    %c0_14 = arith.constant 0 : index
    %c0_15 = arith.constant 0 : index
    %32 = vector.load %arg4[%c0_14, %c0_15] : memref<32x96xf32, #tpu.memory_space<vmem>>, vector<32x96xf32>
    %cst_16 = arith.constant dense<0.000000e+00> : vector<8x96xf32>
    %33 = tpu.matmul %30, %32, %cst_16 {dimension_numbers = #tpu.dot_dimension_numbers<[1], [0], [0], [1], [0, 0, 1, 1], [], []>} : vector<8x32xf32>, vector<32x96xf32>, vector<8x96xf32> -> vector<8x96xf32>
    %c0_17 = arith.constant 0 : index
    %c0_18 = arith.constant 0 : index
    %34 = vector.load %arg1[%c0_17, %c0_18] : memref<8x6xf32, #tpu.memory_space<vmem>>, vector<8x6xf32>
    %c0_19 = arith.constant 0 : index
    %c0_20 = arith.constant 0 : index
    %35 = vector.load %arg5[%c0_19, %c0_20] : memref<6x96xf32, #tpu.memory_space<vmem>>, vector<6x96xf32>
    %cst_21 = arith.constant dense<0.000000e+00> : vector<8x96xf32>
    %36 = tpu.matmul %34, %35, %cst_21 {dimension_numbers = #tpu.dot_dimension_numbers<[1], [0], [0], [1], [0, 0, 1, 1], [], []>} : vector<8x6xf32>, vector<6x96xf32>, vector<8x96xf32> -> vector<8x96xf32>
    %37 = arith.addf %33, %36 : vector<8x96xf32>
    %c0_22 = arith.constant 0 : index
    %c0_23 = arith.constant 0 : index
    %38 = vector.load %arg6[%c0_22, %c0_23] : memref<6x96xf32, #tpu.memory_space<vmem>>, vector<1x96xf32>
    %39 = vector.broadcast %38 : vector<1x96xf32> to vector<8x96xf32>
    %40 = arith.addf %37, %39 : vector<8x96xf32>
    %c1_24 = arith.constant 1 : index
    %c0_25 = arith.constant 0 : index
    %41 = vector.load %arg6[%c1_24, %c0_25] : memref<6x96xf32, #tpu.memory_space<vmem>>, vector<1x96xf32>
    %c2_26 = arith.constant 2 : index
    %c0_27 = arith.constant 0 : index
    %42 = vector.load %arg6[%c2_26, %c0_27] : memref<6x96xf32, #tpu.memory_space<vmem>>, vector<1x96xf32>
    %cst_28 = arith.constant dense<0.000000e+00> : vector<8x96xf32>
    %43 = tpu.matmul %40, %31, %cst_28 {dimension_numbers = #tpu.dot_dimension_numbers<[1], [0], [0], [1], [0, 0, 1, 1], [], []>} : vector<8x96xf32>, vector<96x96xf32>, vector<8x96xf32> -> vector<8x96xf32>
    %44 = arith.mulf %40, %40 : vector<8x96xf32>
    %cst_29 = arith.constant dense<0.000000e+00> : vector<8x96xf32>
    %45 = tpu.matmul %44, %31, %cst_29 {dimension_numbers = #tpu.dot_dimension_numbers<[1], [0], [0], [1], [0, 0, 1, 1], [], []>} : vector<8x96xf32>, vector<96x96xf32>, vector<8x96xf32> -> vector<8x96xf32>
    %46 = arith.mulf %43, %43 : vector<8x96xf32>
    %47 = arith.subf %45, %46 : vector<8x96xf32>
    %cst_30 = arith.constant 9.99999974E-6 : f32
    %48 = vector.broadcast %cst_30 : f32 to vector<8x96xf32>
    %49 = arith.addf %47, %48 : vector<8x96xf32>
    %50 = math.rsqrt %49 : vector<8x96xf32>
    %51 = arith.subf %40, %43 : vector<8x96xf32>
    %52 = arith.mulf %51, %50 : vector<8x96xf32>
    %53 = vector.broadcast %41 : vector<1x96xf32> to vector<8x96xf32>
    %54 = arith.mulf %52, %53 : vector<8x96xf32>
    %55 = vector.broadcast %42 : vector<1x96xf32> to vector<8x96xf32>
    %56 = arith.addf %54, %55 : vector<8x96xf32>
    %57 = arith.negf %56 : vector<8x96xf32>
    %58 = math.exp %57 : vector<8x96xf32>
    %cst_31 = arith.constant 1.000000e+00 : f32
    %59 = vector.broadcast %cst_31 : f32 to vector<8x96xf32>
    %60 = arith.addf %59, %58 : vector<8x96xf32>
    %61 = arith.divf %59, %60 : vector<8x96xf32>
    %62 = arith.mulf %56, %61 : vector<8x96xf32>
    %c0_32 = arith.constant 0 : index
    %c0_33 = arith.constant 0 : index
    %63 = vector.load %arg7[%c0_32, %c0_33] : memref<96x96xf32, #tpu.memory_space<vmem>>, vector<96x96xf32>
    %cst_34 = arith.constant dense<0.000000e+00> : vector<8x96xf32>
    %64 = tpu.matmul %62, %63, %cst_34 {dimension_numbers = #tpu.dot_dimension_numbers<[1], [0], [0], [1], [0, 0, 1, 1], [], []>} : vector<8x96xf32>, vector<96x96xf32>, vector<8x96xf32> -> vector<8x96xf32>
    %c3 = arith.constant 3 : index
    %c0_35 = arith.constant 0 : index
    %65 = vector.load %arg6[%c3, %c0_35] : memref<6x96xf32, #tpu.memory_space<vmem>>, vector<1x96xf32>
    %66 = vector.broadcast %65 : vector<1x96xf32> to vector<8x96xf32>
    %67 = arith.addf %64, %66 : vector<8x96xf32>
    %c4 = arith.constant 4 : index
    %c0_36 = arith.constant 0 : index
    %68 = vector.load %arg6[%c4, %c0_36] : memref<6x96xf32, #tpu.memory_space<vmem>>, vector<1x96xf32>
    %c5 = arith.constant 5 : index
    %c0_37 = arith.constant 0 : index
    %69 = vector.load %arg6[%c5, %c0_37] : memref<6x96xf32, #tpu.memory_space<vmem>>, vector<1x96xf32>
    %cst_38 = arith.constant dense<0.000000e+00> : vector<8x96xf32>
    %70 = tpu.matmul %67, %31, %cst_38 {dimension_numbers = #tpu.dot_dimension_numbers<[1], [0], [0], [1], [0, 0, 1, 1], [], []>} : vector<8x96xf32>, vector<96x96xf32>, vector<8x96xf32> -> vector<8x96xf32>
    %71 = arith.mulf %67, %67 : vector<8x96xf32>
    %cst_39 = arith.constant dense<0.000000e+00> : vector<8x96xf32>
    %72 = tpu.matmul %71, %31, %cst_39 {dimension_numbers = #tpu.dot_dimension_numbers<[1], [0], [0], [1], [0, 0, 1, 1], [], []>} : vector<8x96xf32>, vector<96x96xf32>, vector<8x96xf32> -> vector<8x96xf32>
    %73 = arith.mulf %70, %70 : vector<8x96xf32>
    %74 = arith.subf %72, %73 : vector<8x96xf32>
    %cst_40 = arith.constant 9.99999974E-6 : f32
    %75 = vector.broadcast %cst_40 : f32 to vector<8x96xf32>
    %76 = arith.addf %74, %75 : vector<8x96xf32>
    %77 = math.rsqrt %76 : vector<8x96xf32>
    %78 = arith.subf %67, %70 : vector<8x96xf32>
    %79 = arith.mulf %78, %77 : vector<8x96xf32>
    %80 = vector.broadcast %68 : vector<1x96xf32> to vector<8x96xf32>
    %81 = arith.mulf %79, %80 : vector<8x96xf32>
    %82 = vector.broadcast %69 : vector<1x96xf32> to vector<8x96xf32>
    %83 = arith.addf %81, %82 : vector<8x96xf32>
    %84 = arith.negf %83 : vector<8x96xf32>
    %85 = math.exp %84 : vector<8x96xf32>
    %cst_41 = arith.constant 1.000000e+00 : f32
    %86 = vector.broadcast %cst_41 : f32 to vector<8x96xf32>
    %87 = arith.addf %86, %85 : vector<8x96xf32>
    %88 = arith.divf %86, %87 : vector<8x96xf32>
    %89 = arith.mulf %83, %88 : vector<8x96xf32>
    %c0_42 = arith.constant 0 : index
    %c0_43 = arith.constant 0 : index
    %90 = vector.load %arg9[%c0_42, %c0_43] : memref<3x96xf32, #tpu.memory_space<vmem>>, vector<3x96xf32>
    %cst_44 = arith.constant dense<0.000000e+00> : vector<3x8xf32>
    %91 = tpu.matmul %90, %89, %cst_44 {dimension_numbers = #tpu.dot_dimension_numbers<[1], [1], [0], [0], [0, 0, 1, 0], [], []>} : vector<3x96xf32>, vector<8x96xf32>, vector<3x8xf32> -> vector<3x8xf32>
    %c0_45 = arith.constant 0 : index
    %c0_46 = arith.constant 0 : index
    %92 = vector.load %arg10[%c0_45, %c0_46] : memref<3x1xf32, #tpu.memory_space<vmem>>, vector<3x1xf32>
    %93 = vector.broadcast %92 : vector<3x1xf32> to vector<3x8xf32>
    %94 = arith.addf %91, %93 : vector<3x8xf32>
    %c0_47 = arith.constant 0 : index
    %c0_48 = arith.constant 0 : index
    %95 = vector.load %arg11[%c0_47, %c0_48] : memref<3x8xf32, #tpu.memory_space<vmem>>, vector<3x8xf32>
    tpu.vector_store %arg11[%c0_47, %c0_48], %94 {strides = array<i32>} : memref<3x8xf32, #tpu.memory_space<vmem>>, vector<3x8xf32>,
    return
  }
}

</mosaic_0001>

<bundles_post_ra>
// kernel: tpu_custom_call.1
= control target key start
LH: loop header
LB: loop body
LE: loop exit
PB: predicated region body
PF: predicated region fallthrough
CT: control target
= control target key end

     0   :  { %16 = vsyncpa [#allocation3], 0  ;;  %s1804_s0 = inlined_call_operand.hbm [shape: f32[8,12], index: 0, kind: input, shape index: {}]   ;;  %s1805_s1 = inlined_call_operand.vmem [shape: f32[8,6], index: 1, kind: input, shape index: {}]   ;;  %s1806_s2 = inlined_call_operand.hbm [shape: f32[12,32], index: 2, kind: input, shape index: {}]   ;;  %s1807_s3 = inlined_call_operand.hbm [shape: f32[3,32], index: 3, kind: input, shape index: {}]   ;;  %s1808_s4 = inlined_call_operand.hbm [shape: f32[32,96], index: 4, kind: input, shape index: {}]   ;;  %s1809_s5 = inlined_call_operand.vmem [shape: f32[6,96], index: 5, kind: input, shape index: {}]   ;;  %s1810_s6 = inlined_call_operand.vmem [shape: f32[6,96], index: 6, kind: input, shape index: {}]   ;;  %s1811_s7 = inlined_call_operand.hbm [shape: f32[96,96], index: 7, kind: input, shape index: {}]   ;;  %s1812_s8 = inlined_call_operand.hbm [shape: f32[96,96], index: 8, kind: input, shape index: {}]   ;;  %s1813_s9 = inlined_call_operand.vmem [shape: f32[3,96], index: 9, kind: input, shape index: {}]   ;;  %s1814_s10 = inlined_call_operand.vmem [shape: f32[3,1], index: 10, kind: input, shape index: {}]   ;;  %s1815_s11 = inlined_call_operand.hbm [shape: f32[3,8], index: 11, kind: output, shape index: {}]  }
   0x1   :  { %17 = vsyncpa [#allocation6], 0 }
   0x2   :  { %18 = vsyncpa [#allocation9], 0 }
   0x3   :  { %19 = vsyncpa [#allocation12], 0 }
   0x4   :  { %20 = vsyncpa [#allocation4], 0  ;;  %s1505_s17 = smov [#allocation5]   ;;  %s1341_s21 = scalar_lea.hbm %s1806_s2, 256 }
   0x5   :  { %s38_s18 = sshll.u32 %s1505_s17, 4  ;;  %p1342_p0 = scmp.ne.s32.totalorder %s1806_s2, %s1341_s21  ;;  %s39_s18 = int_to_ptr.vmem [resolvable:$true] %s38_s18 }
   0x6   :  { %p1345_p1 = scmp.lt.u32.totalorder %s1341_s21, %s1806_s2 }
   0x8   :  { %p1347_p2 = pnand %p1345_p1, %p1342_p0 }
   0xa   :  { %1350 = shalt.err (!%p1347_p2)
}
   0xb   :  { %s1351_s26 = scalar_lea.vmem %s39_s18, 256  ;;  %p1356_p4 = scmp.lt.s32.totalorder %s39_s18, %s39_s18 }
   0xc   :  { %p1352_p3 = scmp.ne.s32.totalorder %s39_s18, %s1351_s26  ;;  %p1357_p5 = scmp.lt.s32.totalorder %s1351_s26, %s1351_s26 }
   0xe   :  { %p1358_p6 = por %p1357_p5, %p1356_p4 }
  0x10   :  { %p1359_p7 = pnand %p1358_p6, %p1352_p3 }
  0x12   :  { %1362 = shalt.err (!%p1359_p7)
}
  0x13   :  { %s1506_s27 = smov 128   ;;  %s1507_s28 = smov 8  }
  0x14   :  { %44 = dma.hbm_to_vmem [thread:$0]  %s1806_s2, 256, %s39_s18, [#allocation6], %s1506_s27, %s1506_s27, %s1507_s28  }
  0x15   :  { %s1508_s12 = smov [#allocation8]   ;;  %s1509_s14 = smov [#allocation2]  }
  0x16   :  { %s60_s13 = sshll.u32 %s1508_s12, 4  ;;  %s27_s15 = sshll.u32 %s1509_s14, 4  ;;  %s61_s13 = int_to_ptr.vmem [resolvable:$true] %s60_s13  ;;  %s28_s15 = int_to_ptr.vmem [resolvable:$true] %s27_s15 }
  0x17   :  { %s1363_s19 = scalar_lea.hbm %s1808_s4, 512 }
  0x18   :  { %p1364_p8 = scmp.ne.s32.totalorder %s1808_s4, %s1363_s19  ;;  %p1367_p9 = scmp.lt.u32.totalorder %s1363_s19, %s1808_s4 }
  0x1a   :  { %p1369_p10 = pnand %p1367_p9, %p1364_p8 }
  0x1c   :  { %1372 = shalt.err (!%p1369_p10)
}
  0x1d   :  { %s1373_s2 = scalar_lea.vmem %s61_s13, 512  ;;  %p1378_p12 = scmp.lt.s32.totalorder %s61_s13, %s61_s13 }
  0x1e   :  { %p1374_p11 = scmp.ne.s32.totalorder %s61_s13, %s1373_s2  ;;  %p1379_p13 = scmp.lt.s32.totalorder %s1373_s2, %s1373_s2 }
  0x20   :  { %p1380_p0 = por %p1379_p13, %p1378_p12 }
  0x22   :  { %p1381_p1 = pnand %p1380_p0, %p1374_p11 }
  0x24   :  { %1384 = shalt.err (!%p1381_p1)
}
  0x25   :  { %66 = dma.hbm_to_vmem [thread:$0]  %s1808_s4, 512, %s61_s13, [#allocation9], %s1506_s27, %s1506_s27, %s1507_s28  }
  0x26   :  { %s1385_s29 = scalar_lea.hbm %s1804_s0, 128 }
  0x27   :  { %p1386_p2 = scmp.ne.s32.totalorder %s1804_s0, %s1385_s29  ;;  %p1389_p3 = scmp.lt.u32.totalorder %s1385_s29, %s1804_s0 }
  0x29   :  { %p1391_p4 = pnand %p1389_p3, %p1386_p2 }
  0x2b   :  { %1394 = shalt.err (!%p1391_p4)
}
  0x2c   :  { %s1395_s17 = scalar_lea.vmem %s28_s15, 128  ;;  %p1400_p6 = scmp.lt.s32.totalorder %s28_s15, %s28_s15 }
  0x2d   :  { %p1396_p5 = scmp.ne.s32.totalorder %s28_s15, %s1395_s17  ;;  %p1401_p7 = scmp.lt.s32.totalorder %s1395_s17, %s1395_s17 }
  0x2f   :  { %p1402_p8 = por %p1401_p7, %p1400_p6 }
  0x31   :  { %p1403_p9 = pnand %p1402_p8, %p1396_p5 }
  0x33   :  { %1406 = shalt.err (!%p1403_p9)
}
  0x34   :  { %30 = dma.hbm_to_vmem [thread:$0]  %s1804_s0, 128, %s28_s15, [#allocation3]  }
  0x35   :  { %s1510_s19 = smov [#allocation7]   ;;  %s1511_s21 = smov [#allocation10]  }
  0x36   :  { %s51_s20 = sshll.u32 %s1510_s19, 4  ;;  %s76_s22 = sshll.u32 %s1511_s21, 4  ;;  %s52_s20 = int_to_ptr.vmem [resolvable:$true] %s51_s20  ;;  %s77_s22 = int_to_ptr.vmem [resolvable:$true] %s76_s22 }
  0x37   :  { %s1407_s18 = scalar_lea.hbm %s1807_s3, 64 }
  0x38   :  { %p1408_p10 = scmp.ne.s32.totalorder %s1807_s3, %s1407_s18  ;;  %p1411_p11 = scmp.lt.u32.totalorder %s1407_s18, %s1807_s3 }
  0x3a   :  { %p1413_p12 = pnand %p1411_p11, %p1408_p10 }
  0x3c   :  { %1416 = shalt.err (!%p1413_p12)
}
  0x3d   :  { %s1417_s0 = scalar_lea.vmem %s52_s20, 64  ;;  %p1422_p0 = scmp.lt.s32.totalorder %s52_s20, %s52_s20 }
  0x3e   :  { %p1418_p13 = scmp.ne.s32.totalorder %s52_s20, %s1417_s0  ;;  %p1423_p1 = scmp.lt.s32.totalorder %s1417_s0, %s1417_s0 }
  0x40   :  { %p1424_p2 = por %p1423_p1, %p1422_p0 }
  0x42   :  { %p1425_p3 = pnand %p1424_p2, %p1418_p13 }
  0x44   :  { %1428 = shalt.err (!%p1425_p3)
}
  0x45   :  { %54 = dma.hbm_to_vmem [thread:$0]  %s1807_s3, 64, %s52_s20, [#allocation6]  }
  0x46   :  { %s1429_s16 = scalar_lea.hbm %s1811_s7, 1536 }
  0x47   :  { %p1430_p4 = scmp.ne.s32.totalorder %s1811_s7, %s1429_s16  ;;  %p1433_p5 = scmp.lt.u32.totalorder %s1429_s16, %s1811_s7 }
  0x49   :  { %p1435_p6 = pnand %p1433_p5, %p1430_p4 }
  0x4b   :  { %1438 = shalt.err (!%p1435_p6)
}
  0x4c   :  { %s1439_s21 = scalar_lea.vmem %s77_s22, 1536  ;;  %p1444_p8 = scmp.lt.s32.totalorder %s77_s22, %s77_s22 }
  0x4d   :  { %p1440_p7 = scmp.ne.s32.totalorder %s77_s22, %s1439_s21  ;;  %p1445_p9 = scmp.lt.s32.totalorder %s1439_s21, %s1439_s21 }
  0x4f   :  { %p1446_p10 = por %p1445_p9, %p1444_p8 }
  0x51   :  { %p1447_p11 = pnand %p1446_p10, %p1440_p7 }
  0x53   :  { %1450 = shalt.err (!%p1447_p11)
}
  0x54   :  { %82 = dma.hbm_to_vmem [thread:$0]  %s1811_s7, 1536, %s77_s22, [#allocation9], %s1506_s27, %s1506_s27, %s1507_s28  }
  0x55   :  { %s1512_s23 = smov [#allocation11]   ;;  %s1451_s25 = scalar_lea.hbm %s1812_s8, 1536 }
  0x56   :  { %s88_s2 = sshll.u32 %s1512_s23, 4  ;;  %p1452_p12 = scmp.ne.s32.totalorder %s1812_s8, %s1451_s25  ;;  %s89_s2 = int_to_ptr.vmem [resolvable:$true] %s88_s2 }
  0x57   :  { %p1455_p13 = scmp.lt.u32.totalorder %s1451_s25, %s1812_s8 }
  0x59   :  { %p1457_p0 = pnand %p1455_p13, %p1452_p12 }
  0x5b   :  { %1460 = shalt.err (!%p1457_p0)
}
  0x5c   :  { %s1461_s30 = scalar_lea.vmem %s89_s2, 1536  ;;  %p1466_p2 = scmp.lt.s32.totalorder %s89_s2, %s89_s2 }
  0x5d   :  { %p1462_p1 = scmp.ne.s32.totalorder %s89_s2, %s1461_s30  ;;  %p1467_p3 = scmp.lt.s32.totalorder %s1461_s30, %s1461_s30 }
  0x5f   :  { %p1468_p4 = por %p1467_p3, %p1466_p2 }
  0x61   :  { %p1469_p5 = pnand %p1468_p4, %p1462_p1 }
  0x63   :  { %1472 = shalt.err (!%p1469_p5)
}
  0x64   :  { %94 = dma.hbm_to_vmem [thread:$0]  %s1812_s8, 1536, %s89_s2, [#allocation12], %s1506_s27, %s1506_s27, %s1507_s28  }
  0x65   :  { %1495 = dma.done.wait [#allocation3], 128  }
  0x66   :  { %1496 = vsyncadd [#allocation3], 4294967168 }
  0x67   :  { %1497 = dma.done.wait [#allocation6], 320  }
  0x68   :  { %1498 = vsyncadd [#allocation6], 4294966976 }
  0x69   :  { %1499 = dma.done.wait [#allocation9], 2048  }
  0x6a   :  { %1500 = vsyncadd [#allocation9], 4294965248 }
  0x6b   :  { %1501 = dma.done.wait [#allocation12], 1536  }
  0x6c   :  { %1502 = vsyncadd [#allocation12], 4294965760  ;;  %v1513_v0 = vmov 0.0|0.0   ;;  %vm1514_vm0 = vmmov 0   ;;  %v1515_v1 = vmov 0.0   ;;  %vm129_vm1 = vcmask 1043456  }
  0x6d   :  { %1209 = vmatprep.subr.bf16.mxu1 %v1513_v0  ;;  %1219 = vmatprep.subr.bf16.mxu0 %v1513_v0  ;;  %v118_v2 = vld [vmem:[#allocation5] sm:$0xff]  ;;  %v119_v3 = vld [vmem:[#allocation5 + $0x8] sm:$0xf]  ;;  %vm1516_vm2 = vmmov 1   ;;  %v117_v5 = vld [vmem:[#allocation2] sm:$0xff]  ;;  %vm125_vm4 = vcmask 97280  }
  0x6e   :  { %1050 = vmatprep.mubr.msk.f32.mxu1 %vm1514_vm0, %v1515_v1  ;;  %1093 = vmatprep.mubr.msk.f32.mxu0 %vm1514_vm0, %v1515_v1  ;;  %vm1211_vm3 = vmpackc.low %vm129_vm1, %vm1516_vm2  ;;  %v1210_v4 = vpack.c.bf16 %v119_v3, %v118_v2  ;;  %v946_v6 = vld [vmem:[#allocation7] ss:$0 sm:$0xff]  ;;  %vm203_vm5 = vcmask 261120   ;;  %v250_v13 = vld [vmem:[%s1809_s5] sm:$0x3f]  ;;  %vm255_vm6 = vcmask 1045504  }
  0x6f   :  { %v249_v14 = vld [vmem:[%s1805_s1] sm:$0xff]  ;;  %vm251_vm7 = vcmask 48128   ;;  %v247_v17 = vld [vmem:[#allocation8 + $0x10] sm:$0xff]  ;;  %v248_v18 = vld [vmem:[#allocation8 + $0x18] sm:$0xff]  ;;  %vm410_vm8 = vcmask 785408   ;;  %s1518_s25 = smov [#allocation13]  }
  0x70   :  { %1212 = vmatpush3.bf16.msk.msra.mxu1 %vm1211_vm3, %v1210_v4  ;;  %v245_v15 = vld [vmem:[#allocation8] sm:$0xff]  ;;  %v246_v16 = vld [vmem:[#allocation8 + $0x8] sm:$0xff]  ;;  %v1217_v20 = vpack.c.bf16 %v248_v18, %v247_v17  ;;  %v235_v24 = vld [vmem:[#allocation11 + $0x10] sm:$0xff]  ;;  %vm926_vm9 = vcmask 59392  }
  0x71   :  { %1053 = vmatprep.subr.mxu1 %v1515_v1  ;;  %v1214_v19 = vpack.c.bf16 %v246_v16, %v245_v15  ;;  %v233_v21 = vld [vmem:[#allocation11] sm:$0xff]  ;;  %v234_v22 = vld [vmem:[#allocation11 + $0x8] sm:$0xff]  ;;  %v236_v25 = vld [vmem:[#allocation11 + $0x18] sm:$0xff] }
  0x72   :  { %v1685_v23 = vpack.c.bf16 %v234_v22, %v233_v21  ;;  %v1688_v26 = vpack.c.bf16 %v236_v25, %v235_v24  ;;  %v237_v27 = vld [vmem:[#allocation11 + $0x20] sm:$0xff]  ;;  %v238_v28 = vld [vmem:[#allocation11 + $0x28] sm:$0xff]  ;;  %v239_v30 = vld [vmem:[#allocation11 + $0x30] sm:$0xff] }
  0x73   :  { %1051 = vmatmul.mubr.msk.f32.vlgmr.msra.gmra.mrb[0].mxu1 %vm125_vm4, %v117_v5  ;;  %v1692_v29 = vpack.c.bf16 %v238_v28, %v237_v27  ;;  %v240_v31 = vld [vmem:[#allocation11 + $0x38] sm:$0xff]  ;;  %v241_v32 = vld [vmem:[#allocation11 + $0x40] sm:$0xff]  ;;  %v242_v34 = vld [vmem:[#allocation11 + $0x48] sm:$0xff] }
  0x74   :  { %1055 = vmatprep.mubr.msk.f32.mxu1 %vm1514_vm0, %v1515_v1  ;;  %1054 = vmatpush3.msk.msra.mxu1 %vm255_vm6, %v250_v13  ;;  %v1697_v33 = vpack.c.bf16 %v240_v31, %v239_v30  ;;  %v1700_v35 = vpack.c.bf16 %v242_v34, %v241_v32  ;;  %v949_v45 = vld [vmem:[#allocation7 + $0x1] ss:$0 sm:$0xff]  ;;  %v950_v47 = vld [vmem:[#allocation7 + $0x2] ss:$0 sm:$0xff]  ;;  %v243_v53 = vld [vmem:[#allocation11 + $0x50] sm:$0xff] }
  0x75   :  { %1213 = vmatprep.subr.bf16.mxu1 %v1513_v0  ;;  %1221 = vmatpush3.bf16.msra.mxu0 %v1685_v23  ;;  %v244_v54 = vld [vmem:[#allocation11 + $0x58] sm:$0xff]  ;;  %v954_v57 = vld [vmem:[%s1810_s6] ss:$0 sm:$0xff]  ;;  %v582_v63 = vld [vmem:[#allocation10 + $0x8] sm:$0xff] }
  0x76   :  { %1222 = vmatprep.subr.bf16.mxu0 %v1513_v0  ;;  %v1718_v55 = vpack.c.bf16 %v244_v54, %v243_v53  ;;  %v581_v62 = vld [vmem:[#allocation10] sm:$0xff]  ;;  %v583_v2 = vld [vmem:[#allocation10 + $0x10] sm:$0xff]  ;;  %v584_v4 = vld [vmem:[#allocation10 + $0x18] sm:$0xff] }
  0x77   :  { %1056 = vmatmul.mubr.msk.f32.vlgmr.msra.gmra.mrb[2].mxu1 %vm251_vm7, %v249_v14  ;;  %v1256_v3 = vpack.c.bf16 %v582_v63, %v581_v62  ;;  %v1259_v5 = vpack.c.bf16 %v584_v4, %v583_v2  ;;  %v590_v13 = vld [vmem:[#allocation10 + $0x48] sm:$0xff]  ;;  %v591_v15 = vld [vmem:[#allocation10 + $0x50] sm:$0xff]  ;;  %v592_v16 = vld [vmem:[#allocation10 + $0x58] sm:$0xff] }
  0x78   :  { %1066 = vmatprep.mubr.msk.f32.mxu1 %vm1514_vm0, %v1515_v1  ;;  %1215 = vmatpush3.bf16.msra.mxu1 %v1214_v19  ;;  %v1271_v17 = vpack.c.bf16 %v592_v16, %v591_v15  ;;  %v957_v30 = vld [vmem:[%s1810_s6 + $0x1] ss:$0 sm:$0xff]  ;;  %v958_v32 = vld [vmem:[%s1810_s6 + $0x2] ss:$0 sm:$0xff]  ;;  %v965_v53 = vld [vmem:[%s1810_s6 + $0x5] ss:$0 sm:$0xff] }
  0x79   :  { %1216 = vmatprep.subr.bf16.mxu1 %v1513_v0  ;;  %1224 = vmatpush3.bf16.msra.mxu0 %v1688_v26 }
  0x7a   :  { %1225 = vmatprep.subr.bf16.mxu0 %v1513_v0 }
  0x7c   :  { %1218 = vmatpush3.bf16.msra.mxu1 %v1217_v20 }
  0x7d   :  { %1237 = vmatprep.subr.bf16.mxu1 %v1513_v0  ;;  %1227 = vmatpush3.bf16.msra.mxu0 %v1692_v29 }
  0x7e   :  { %1228 = vmatprep.subr.bf16.mxu0 %v1513_v0 }
  0x81   :  { %1230 = vmatpush3.bf16.msra.mxu0 %v1697_v33 }
  0x82   :  { %1231 = vmatprep.subr.bf16.mxu0 %v1513_v0 }
  0x85   :  { %1233 = vmatpush3.bf16.msra.mxu0 %v1700_v35 }
  0x86   :  { %1234 = vmatprep.subr.bf16.mxu0 %v1513_v0 }
  0x89   :  { %1236 = vmatpush3.bf16.msra.mxu0 %v1718_v55 }
  0x8a   :  { %1255 = vmatprep.subr.bf16.mxu0 %v1513_v0 }
 0x146   :  { %v199_v7 = vpop.f32.mrb[0].mxu1 }
 0x147   :  { %v200_v8 = vadd.f32 %v946_v6, %v199_v7  ;;  %v1052_v9 = vpop.f32.mrb[1].mxu1  ;;  %v585_v6 = vld [vmem:[#allocation10 + $0x20] sm:$0xff]  ;;  %v586_v7 = vld [vmem:[#allocation10 + $0x28] sm:$0xff] }
 0x148   :  { %v587_v9 = vld [vmem:[#allocation10 + $0x30] sm:$0xff] }
 0x149   :  { %v204_v10 = vsel %vm203_vm5, %v200_v8, 0.0  ;;  %v209_v11 = vmul.f32 %v200_v8, %v200_v8 }
 0x14a   :  { %205 = vadd.xlane.f32.xlu0 %v204_v10  ;;  %v325_v51 = vpop.f32.mrb[2].mxu1  ;;  %v588_v10 = vld [vmem:[#allocation10 + $0x38] sm:$0xff] }
 0x14b   :  { %v210_v12 = vsel %vm203_vm5, %v209_v11, 0.0  ;;  %v1057_v52 = vpop.f32.mrb[3].mxu1  ;;  %v1265_v11 = vpack.c.bf16 %v588_v10, %v587_v9 }
 0x14e   :  { %211 = vadd.xlane.f32.xlu0 %v210_v12  ;;  %v589_v12 = vld [vmem:[#allocation10 + $0x40] sm:$0xff] }
 0x14f   :  { %v1268_v14 = vpack.c.bf16 %v590_v13, %v589_v12 }
 0x1d7   :  { %v206_v36 = vpop.xlane.xlu0 %205 }
 0x1d8   :  { %v208_v37 = vmul.f32 0.03125, %v206_v36 }
 0x1da   :  { %v214_v39 = vmul.f32 %v208_v37, %v208_v37  ;;  %v218_v43 = vsub.f32 %v200_v8, %v208_v37  ;;  %v1262_v8 = vpack.c.bf16 %v586_v7, %v585_v6 }
 0x1db   :  { %v212_v38 = vpop.xlane.xlu0 %211 }
 0x1dc   :  { %v213_v40 = vmul.f32 0.03125, %v212_v38 }
 0x1de   :  { %v215_v41 = vsub.f32 %v213_v40, %v214_v39 }
 0x1e0   :  { %v216_v42 = vadd.f32 1e-05, %v215_v41 }
 0x1e2   :  { %1325 = vrsqrt.f32 %v216_v42 }
 0x1ec   :  { %v1326_v44 = vpop.eup %1325 }
 0x1ed   :  { %v219_v46 = vmul.f32 %v1326_v44, %v218_v43 }
 0x1ef   :  { %v225_v48 = vmul.f32 %v949_v45, %v219_v46 }
 0x1f1   :  { %v231_v49 = vadd.f32 %v950_v47, %v225_v48 }
 0x1f3   :  { %1327 = vtanh.f32 %v231_v49 }
 0x1fd   :  { %v1328_v50 = vpop.eup %1327 }
 0x1fe   :  { %1067 = vmatmul.mubr.msk.f32.vlgmr.msra.gmra.mrb[4].mxu1 %vm203_vm5, %v1328_v50 }
 0x1ff   :  { %1239 = vmatpush3.bf16.msra.mxu1 %v1685_v23  ;;  %1120 = vmatprep.mubr.msk.f32.mxu1 %vm1514_vm0, %v1515_v1 }
 0x200   :  { %1240 = vmatprep.subr.bf16.mxu1 %v1513_v0 }
 0x203   :  { %1242 = vmatpush3.bf16.msra.mxu1 %v1688_v26 }
 0x204   :  { %1243 = vmatprep.subr.bf16.mxu1 %v1513_v0 }
 0x207   :  { %1245 = vmatpush3.bf16.msra.mxu1 %v1692_v29 }
 0x208   :  { %1246 = vmatprep.subr.bf16.mxu1 %v1513_v0 }
 0x20b   :  { %1248 = vmatpush3.bf16.msra.mxu1 %v1697_v33 }
 0x20c   :  { %1249 = vmatprep.subr.bf16.mxu1 %v1513_v0 }
 0x20f   :  { %1251 = vmatpush3.bf16.msra.mxu1 %v1700_v35 }
 0x210   :  { %1252 = vmatprep.subr.bf16.mxu1 %v1513_v0 }
 0x213   :  { %1254 = vmatpush3.bf16.msra.mxu1 %v1718_v55 }
 0x214   :  { %1273 = vmatprep.subr.bf16.mxu1 %v1513_v0 }
 0x2d1   :  { %v398_v56 = vpop.f32.mrb[4].mxu1 }
 0x2d2   :  { %v399_v58 = vadd.f32 %v398_v56, %v325_v51  ;;  %v1068_v59 = vpop.f32.mrb[5].mxu1  ;;  %v964_v51 = vld [vmem:[%s1810_s6 + $0x4] ss:$0 sm:$0xff] }
 0x2d4   :  { %v407_v60 = vadd.f32 %v954_v57, %v399_v58 }
 0x2d6   :  { %v484_v61 = vmul.f32 %v407_v60, %v407_v60  ;;  %1094 = vmatmul.mubr.msk.f32.vlgmr.msra.gmra.mrb[0].mxu0 %vm410_vm8, %v407_v60 }
 0x2d7   :  { %1147 = vmatprep.mubr.msk.f32.mxu0 %vm1514_vm0, %v1515_v1  ;;  %1257 = vmatpush3.bf16.msra.mxu0 %v1256_v3 }
 0x2d8   :  { %1121 = vmatmul.mubr.msk.f32.vlgmr.msra.gmra.mrb[6].mxu1 %vm410_vm8, %v484_v61  ;;  %1258 = vmatprep.subr.bf16.mxu0 %v1513_v0  ;;  %v843_v61 = vld [vmem:[%s1813_s9] sm:$0x7] }
 0x2d9   :  { %1275 = vmatpush3.bf16.msra.mxu1 %v1685_v23  ;;  %1174 = vmatprep.mubr.msk.f32.mxu1 %vm1514_vm0, %v1515_v1 }
 0x2da   :  { %1276 = vmatprep.subr.bf16.mxu1 %v1513_v0 }
 0x2db   :  { %1260 = vmatpush3.bf16.msra.mxu0 %v1259_v5 }
 0x2dc   :  { %1261 = vmatprep.subr.bf16.mxu0 %v1513_v0 }
 0x2dd   :  { %1278 = vmatpush3.bf16.msra.mxu1 %v1688_v26 }
 0x2de   :  { %1279 = vmatprep.subr.bf16.mxu1 %v1513_v0 }
 0x2df   :  { %1263 = vmatpush3.bf16.msra.mxu0 %v1262_v8 }
 0x2e0   :  { %1264 = vmatprep.subr.bf16.mxu0 %v1513_v0 }
 0x2e1   :  { %1281 = vmatpush3.bf16.msra.mxu1 %v1692_v29 }
 0x2e2   :  { %1282 = vmatprep.subr.bf16.mxu1 %v1513_v0 }
 0x2e3   :  { %1266 = vmatpush3.bf16.msra.mxu0 %v1265_v11 }
 0x2e4   :  { %1267 = vmatprep.subr.bf16.mxu0 %v1513_v0 }
 0x2e5   :  { %1284 = vmatpush3.bf16.msra.mxu1 %v1697_v33 }
 0x2e6   :  { %1285 = vmatprep.subr.bf16.mxu1 %v1513_v0 }
 0x2e7   :  { %1269 = vmatpush3.bf16.msra.mxu0 %v1268_v14 }
 0x2e8   :  { %1270 = vmatprep.subr.bf16.mxu0 %v1513_v0 }
 0x2e9   :  { %1287 = vmatpush3.bf16.msra.mxu1 %v1700_v35 }
 0x2ea   :  { %1288 = vmatprep.subr.bf16.mxu1 %v1513_v0 }
 0x2eb   :  { %1272 = vmatpush3.bf16.msra.mxu0 %v1271_v17 }
 0x2ec   :  { %1291 = vmatprep.subr.bf16.mxu0 %v1513_v0 }
 0x2ed   :  { %1290 = vmatpush3.bf16.msra.mxu1 %v1718_v55 }
 0x2ee   :  { %1204 = vmatprep.subr.mxu1 %v1515_v1 }
 0x3a9   :  { %v480_v18 = vpop.f32.mrb[0].mxu0 }
 0x3aa   :  { %v558_v19 = vmul.f32 %v480_v18, %v480_v18  ;;  %v1095_v20 = vpop.f32.mrb[1].mxu0  ;;  %v562_v27 = vsub.f32 %v407_v60, %v480_v18 }
 0x3ab   :  { %v554_v21 = vpop.f32.mrb[6].mxu1 }
 0x3ac   :  { %v559_v22 = vsub.f32 %v554_v21, %v558_v19  ;;  %v1122_v24 = vpop.f32.mrb[7].mxu1 }
 0x3ae   :  { %v560_v25 = vadd.f32 1e-05, %v559_v22 }
 0x3b0   :  { %1329 = vrsqrt.f32 %v560_v25 }
 0x3ba   :  { %v1330_v28 = vpop.eup %1329 }
 0x3bb   :  { %v563_v31 = vmul.f32 %v1330_v28, %v562_v27 }
 0x3bd   :  { %v568_v34 = vmul.f32 %v957_v30, %v563_v31 }
 0x3bf   :  { %v573_v36 = vadd.f32 %v958_v32, %v568_v34 }
 0x3c1   :  { %v959_v37 = vmul.f32 -1.442695, %v573_v36 }
 0x3c3   :  { %1331 = vpow2.f32 %v959_v37 }
 0x3cd   :  { %v1332_v38 = vpop.eup %1331 }
 0x3ce   :  { %v577_v39 = vadd.f32 1.0, %v1332_v38 }
 0x3d0   :  { %1333 = vrcp.f32 %v577_v39 }
 0x3da   :  { %v1334_v40 = vpop.eup %1333 }
 0x3db   :  { %v580_v41 = vmul.f32 %v1334_v40, %v573_v36 }
 0x3dd   :  { %1148 = vmatmul.mubr.msk.f32.vlgmr.msra.gmra.mrb[2].mxu0 %vm410_vm8, %v580_v41 }
 0x3de   :  { %1293 = vmatpush3.bf16.msra.mxu0 %v1685_v23  ;;  %1201 = vmatprep.mubr.msk.f32.mxu0 %vm1514_vm0, %v1515_v1  ;;  %v960_v23 = vld [vmem:[%s1810_s6 + $0x3] ss:$0 sm:$0xff]  ;;  %s934_s6 = sshll.u32 %s1518_s25, 4  ;;  %s935_s6 = int_to_ptr.vmem [resolvable:$true] %s934_s6 }
 0x3df   :  { %1294 = vmatprep.subr.bf16.mxu0 %v1513_v0  ;;  %s1473_s26 = scalar_lea.vmem %s935_s6, 64  ;;  %p1478_p7 = scmp.lt.s32.totalorder %s935_s6, %s935_s6 }
 0x3e0   :  { %p1474_p6 = scmp.ne.s32.totalorder %s935_s6, %s1473_s26  ;;  %p1479_p8 = scmp.lt.s32.totalorder %s1473_s26, %s1473_s26 }
 0x3e2   :  { %1296 = vmatpush3.bf16.msra.mxu0 %v1688_v26  ;;  %p1480_p9 = por %p1479_p8, %p1478_p7 }
 0x3e3   :  { %1297 = vmatprep.subr.bf16.mxu0 %v1513_v0 }
 0x3e4   :  { %p1481_p10 = pnand %p1480_p9, %p1474_p6 }
 0x3e6   :  { %1299 = vmatpush3.bf16.msra.mxu0 %v1692_v29 }
 0x3e7   :  { %1300 = vmatprep.subr.bf16.mxu0 %v1513_v0 }
 0x3ea   :  { %1302 = vmatpush3.bf16.msra.mxu0 %v1697_v33  ;;  %v1517_v33 = vmov 0  }
 0x3eb   :  { %1303 = vmatprep.subr.bf16.mxu0 %v1513_v0  ;;  %1323 = vset.pattern.permute.xlu1 %v1517_v33 }
 0x3ec   :  { %1324 = vset.pattern.permute.xlu0 %v1517_v33 }
 0x3ee   :  { %1305 = vmatpush3.bf16.msra.mxu0 %v1700_v35 }
 0x3ef   :  { %1306 = vmatprep.subr.bf16.mxu0 %v1513_v0  ;;  %v844_v0 = vld [vmem:[%s1814_s10] sm:$0x7] }
 0x3f0   :  { %847 = vperm.xlu1 %1323, %v844_v0  }
 0x3f2   :  { %1308 = vmatpush3.bf16.msra.mxu0 %v1718_v55 }
 0x46f   :  { %v848_v62 = vpop.permute.xlu1 %847 }
 0x4b0   :  { %v667_v26 = vpop.f32.mrb[2].mxu0 }
 0x4b1   :  { %v668_v42 = vadd.f32 %v960_v23, %v667_v26  ;;  %v1149_v43 = vpop.f32.mrb[3].mxu0 }
 0x4b3   :  { %v746_v29 = vmul.f32 %v668_v42, %v668_v42  ;;  %1175 = vmatmul.mubr.msk.f32.vlgmr.msra.gmra.mrb[8].mxu1 %vm410_vm8, %v668_v42 }
 0x4b4   :  { %1206 = vmatprep.mubr.msk.f32.mxu1 %vm1514_vm0, %v1515_v1 }
 0x4b5   :  { %1202 = vmatmul.mubr.msk.f32.vlgmr.msra.gmra.mrb[4].mxu0 %vm410_vm8, %v746_v29 }
 0x586   :  { %v742_v35 = vpop.f32.mrb[8].mxu1 }
 0x587   :  { %v820_v44 = vmul.f32 %v742_v35, %v742_v35  ;;  %v1176_v45 = vpop.f32.mrb[9].mxu1  ;;  %v824_v50 = vsub.f32 %v668_v42, %v742_v35 }
 0x588   :  { %v816_v46 = vpop.f32.mrb[4].mxu0 }
 0x589   :  { %v821_v47 = vsub.f32 %v816_v46, %v820_v44  ;;  %v1203_v48 = vpop.f32.mrb[5].mxu0 }
 0x58b   :  { %v822_v49 = vadd.f32 1e-05, %v821_v47 }
 0x58d   :  { %1335 = vrsqrt.f32 %v822_v49 }
 0x597   :  { %v1336_v1 = vpop.eup %1335 }
 0x598   :  { %v825_v52 = vmul.f32 %v1336_v1, %v824_v50 }
 0x59a   :  { %v830_v54 = vmul.f32 %v964_v51, %v825_v52 }
 0x59c   :  { %v835_v55 = vadd.f32 %v965_v53, %v830_v54 }
 0x59e   :  { %v966_v56 = vmul.f32 -1.442695, %v835_v55 }
 0x5a0   :  { %1337 = vpow2.f32 %v966_v56 }
 0x5aa   :  { %v1338_v57 = vpop.eup %1337 }
 0x5ab   :  { %v839_v58 = vadd.f32 1.0, %v1338_v57 }
 0x5ad   :  { %1339 = vrcp.f32 %v839_v58 }
 0x5b7   :  { %v1340_v59 = vpop.eup %1339 }
 0x5b8   :  { %v842_v60 = vmul.f32 %v1340_v59, %v835_v55 }
 0x5ba   :  { %1205 = vmatpush3.xpose.msk.msra.mxu1 %vm410_vm8, %v842_v60 }
 0x5bd   :  { %1207 = vmatmul.mubr.msk.f32.vlgmr.msra.gmra.mrb[10].mxu1 %vm410_vm8, %v843_v61 }
 0x690   :  { %v922_v63 = vpop.f32.mrb[10].mxu1 }
 0x691   :  { %v923_v2 = vadd.f32 %v922_v63, %v848_v62  ;;  %v1208_v3 = vpop.f32.mrb[11].mxu1 }
 0x693   :  { %927 = vst.msk [vmem:[#allocation13] sm:$0x7] %vm926_vm9, %v923_v2 }
 0x694   :  { %1484 = shalt.err (!%p1481_p10)
}
 0x695   :  { %s1485_s0 = scalar_lea.hbm %s1815_s11, 64 }
 0x696   :  { %p1486_p11 = scmp.ne.s32.totalorder %s1815_s11, %s1485_s0  ;;  %p1489_p12 = scmp.lt.u32.totalorder %s1485_s0, %s1815_s11 }
 0x698   :  { %p1491_p13 = pnand %p1489_p12, %p1486_p11 }
 0x69a   :  { %1494 = shalt.err (!%p1491_p13)
}
 0x69b   :  { %937 = dma.vmem_to_hbm [thread:$0]  %s935_s6, 64, %s1815_s11, [#allocation4]  }
 0x69c   :  { %1503 = dma.done.wait [#allocation4], 64  }
 0x69d   :  { %1504 = vsyncadd [#allocation4], 4294967232 }
 0x69e   :  { %941 = vsyncpa [#allocation3], 1 }
 0x69f   :  { %942 = vsyncpa [#allocation6], 1 }
 0x6a0   :  { %943 = vsyncpa [#allocation9], 1 }
 0x6a1   :  { %944 = vsyncpa [#allocation12], 1 }
 0x6a2   :  { %945 = vsyncpa [#allocation4], 1 }

</bundles_post_ra>
